<compile_context>
chip_gen: v5e
topology: v5e:2x2
jax: 0.10.0
libtpu: 0.0.40
codegen_flags: <defaults>
</compile_context>

<pallas_src>
import jax
import jax.numpy as jnp
from jax.experimental import pallas as pl
from jax.experimental.pallas import tpu as pltpu


def _round_up(x, m):
    return ((x + m - 1) // m) * m


def _cdiv(a, b):
    return -(-a // b)


# ----------------------------- Pallas kernels --------------------------------
def _stage1_kernel(x_ref, w1_ref, b1_ref, w2_ref, b2_ref, h2_ref):
    # x_ref : (K_pad, tm) bf16 -- im2col columns, pixel index on the lane axis.
    # conv1 (3x3 valid, all 9 taps fused into K) as a single MXU matmul.
    h1 = jnp.dot(w1_ref[...], x_ref[...],
                 preferred_element_type=jnp.float32) + b1_ref[...]      # (C1, tm)
    h1 = jnp.maximum(h1, 0.2 * h1)                                      # LeakyReLU(0.2)
    # conv2 (1x1) as one f32 matmul -> (C2, tm), lane-dense.
    h2 = jnp.dot(w2_ref[...], h1,
                 preferred_element_type=jnp.float32) + b2_ref[...]
    h2_ref[...] = h2


def _stage2_kernel(h2_ref, scale_ref, shift_ref, w3_ref, b3_ref, out_ref):
    # BatchNorm (precomputed scale/shift) + LeakyReLU + conv3 (C2->1) + sigmoid.
    h = h2_ref[...] * scale_ref[...] + shift_ref[...]                   # (C2, tm)
    h = jnp.maximum(h, 0.2 * h)                                         # LeakyReLU(0.2)
    logit = jnp.sum(h * w3_ref[...], axis=0, keepdims=True) + b3_ref[...]
    out_ref[...] = jax.nn.sigmoid(logit)                                # (1, tm), lane-dense


# ------------------------------- Wrapper --------------------------------------
def discriminator_forward(x1_nchw, x2_nchw, params):
    """x1, x2: (N, C, H, W) float32. Returns (N, 1, H-2, W-2), PyTorch layout."""
    w1, b1, w2, b2, gamma, beta, w3, b3 = params   # PyTorch layouts (OIHW, ...)

    # ---- static shapes ----
    N, _, H, W = x1_nchw.shape
    x = jnp.concatenate([x1_nchw, x2_nchw], axis=1)          # (N, Cin, H, W)
    cin = x.shape[1]
    c1 = w1.shape[0]
    c2 = w2.shape[0]
    ho, wo = H - 2, W - 2
    m = N * ho * wo                                           # total output pixels
    k = cin * 9
    k_pad = _round_up(k, 16)                                  # bf16 sublane-friendly

    # ---- tiling: pixel axis on lanes, tiles of tm (multiple of 128) ----
    m_blocks = _cdiv(m, 128)
    num_tiles = _cdiv(m_blocks, 64)           # cap tm at 64*128 = 8192 px (~1 MiB bf16 block)
    if m_blocks > 1:
        num_tiles = max(num_tiles, 2)         # keep both v7x TensorCores busy
        if num_tiles % 2:
            num_tiles += 1                    # even tile count -> balanced megacore split
    tm_blocks = _cdiv(m_blocks, num_tiles)
    tm = tm_blocks * 128
    m_pad = num_tiles * tm

    # ---- im2col, transposed: (k_pad, m_pad) bf16, pixel index lane-dense ----
    xb = x.astype(jnp.bfloat16)
    patches = [xb[:, :, di:di + ho, dj:dj + wo]
               for di in range(3) for dj in range(3)]         # each (N, Cin, Ho, Wo)
    xcol = jnp.stack(patches, axis=2)                         # (N, Cin, 9, Ho, Wo)
    xcol = jnp.transpose(xcol, (1, 2, 0, 3, 4)).reshape(k, m)  # k-index = c*9 + di*3 + dj
    xcol = jnp.pad(xcol, ((0, k_pad - k), (0, m_pad - m)))

    # ---- weight prep (kernel layouts) ----
    w1k = jnp.pad(w1.reshape(c1, k), ((0, 0), (0, k_pad - k))).astype(jnp.bfloat16)  # (C1, K_pad)
    b1k = b1.reshape(c1, 1).astype(jnp.float32)
    w2k = w2[:, :, 0, 0].astype(jnp.float32)                  # (C2, C1)
    b2k = b2.reshape(c2, 1).astype(jnp.float32)
    w3k = w3[0, :, 0, 0].reshape(c2, 1).astype(jnp.float32)   # (C2, 1)
    b3k = b3.reshape(1, 1).astype(jnp.float32)

    cparams = pltpu.CompilerParams(
        dimension_semantics=("parallel",),
        vmem_limit_bytes=32 * 1024 * 1024,
    )

    # ---- pass 1: conv1 + LeakyReLU + conv2 -> h2 cache (C2, m_pad) f32 ----
    h2_full = pl.pallas_call(
        _stage1_kernel,
        grid=(num_tiles,),
        in_specs=[pl.BlockSpec((k_pad, tm), lambda i: (0, i)),
                  pl.BlockSpec((c1, k_pad), lambda i: (0, 0)),
                  pl.BlockSpec((c1, 1), lambda i: (0, 0)),
                  pl.BlockSpec((c2, c1), lambda i: (0, 0)),
                  pl.BlockSpec((c2, 1), lambda i: (0, 0))],
        out_specs=pl.BlockSpec((c2, tm), lambda i: (0, i)),
        out_shape=jax.ShapeDtypeStruct((c2, m_pad), jnp.float32),
        compiler_params=cparams,
    )(xcol, w1k, b1k, w2k, b2k)

    # ---- BatchNorm batch statistics (training mode, biased var) ----
    # Tiny per-channel reduction over the h2 cache; done in plain JAX so the
    # kernels never recompute conv1/conv2 and stats stay exactly consistent
    # with the cached values pass 2 consumes.
    h2_valid = h2_full[:, :m]                                  # drop padded pixels
    mean = jnp.mean(h2_valid, axis=1)
    var = jnp.var(h2_valid, axis=1)
    inv = jax.lax.rsqrt(var + 1e-5)
    scale = (gamma * inv).reshape(c2, 1).astype(jnp.float32)
    shift = (beta - mean * gamma * inv).reshape(c2, 1).astype(jnp.float32)

    # ---- pass 2: BN + LeakyReLU + conv3 + sigmoid, lane-dense (1, m_pad) ----
    out_flat = pl.pallas_call(
        _stage2_kernel,
        grid=(num_tiles,),
        in_specs=[pl.BlockSpec((c2, tm), lambda i: (0, i)),
                  pl.BlockSpec((c2, 1), lambda i: (0, 0)),
                  pl.BlockSpec((c2, 1), lambda i: (0, 0)),
                  pl.BlockSpec((c2, 1), lambda i: (0, 0)),
                  pl.BlockSpec((1, 1), lambda i: (0, 0))],
        out_specs=pl.BlockSpec((1, tm), lambda i: (0, i)),
        out_shape=jax.ShapeDtypeStruct((1, m_pad), jnp.float32),
        compiler_params=cparams,
    )(h2_full, scale, shift, w3k, b3k)

    # ---- strip padding, back to NCHW ----
    out = out_flat[0, :m].reshape(N, ho, wo)
    return out[:, None, :, :]


# --------------------------- Parameter creation -------------------------------
def make_params(key, in_c, out_c, ndf):
    """PyTorch-layout params mimicking weights_init: conv ~ N(0, 0.02),
    BN weight ~ N(1, 0.02), BN bias = 0. Conv biases small normal."""
    cin = in_c + out_c
    c1, c2 = ndf * 2, ndf
    ks = jax.random.split(key, 6)
    w1 = 0.02 * jax.random.normal(ks[0], (c1, cin, 3, 3), jnp.float32)   # OIHW
    b1 = 0.02 * jax.random.normal(ks[1], (c1,), jnp.float32)
    w2 = 0.02 * jax.random.normal(ks[2], (c2, c1, 1, 1), jnp.float32)
    b2 = 0.02 * jax.random.normal(ks[3], (c2,), jnp.float32)
    gamma = 1.0 + 0.02 * jax.random.normal(ks[4], (c2,), jnp.float32)
    beta = jnp.zeros((c2,), jnp.float32)
    w3 = 0.02 * jax.random.normal(ks[5], (1, c2, 1, 1), jnp.float32)
    b3 = jnp.zeros((1,), jnp.float32)
    return (w1, b1, w2, b2, gamma, beta, w3, b3)


# ------------------------------ Reference -------------------------------------
def reference_forward(x1, x2, params):
    """Pure-JAX f32 reference matching the PyTorch module."""
    w1, b1, w2, b2, gamma, beta, w3, b3 = params
    dn = ('NCHW', 'OIHW', 'NCHW')
    x = jnp.concatenate([x1, x2], axis=1)
    h = jax.lax.conv_general_dilated(x, w1, (1, 1), 'VALID', dimension_numbers=dn)
    h = h + b1[None, :, None, None]
    h = jnp.where(h > 0, h, 0.2 * h)
    h = jax.lax.conv_general_dilated(h, w2, (1, 1), 'VALID', dimension_numbers=dn)
    h = h + b2[None, :, None, None]
    mean = jnp.mean(h, axis=(0, 2, 3), keepdims=True)
    var = jnp.mean((h - mean) ** 2, axis=(0, 2, 3), keepdims=True)
    h = (h - mean) * jax.lax.rsqrt(var + 1e-5)
    h = h * gamma[None, :, None, None] + beta[None, :, None, None]
    h = jnp.where(h > 0, h, 0.2 * h)
    h = jax.lax.conv_general_dilated(h, w3, (1, 1), 'VALID', dimension_numbers=dn)
    h = h + b3[None, :, None, None]
    return jax.nn.sigmoid(h)


# --------------------------------- Main ---------------------------------------
if __name__ == "__main__":
    # Small shapes consistent with the module: batch=2, in_c=3, out_c=3, ndf=8, 16x16.
    N, in_c, out_c, ndf, H, W = 2, 3, 3, 8, 16, 16

    key = jax.random.PRNGKey(0)
    k_x1, k_x2, k_p = jax.random.split(key, 3)
    x1 = jax.random.normal(k_x1, (N, in_c, H, W), jnp.float32)
    x2 = jax.random.normal(k_x2, (N, out_c, H, W), jnp.float32)
    params = make_params(k_p, in_c, out_c, ndf)

    out = jax.jit(discriminator_forward)(x1, x2, params)
    out = jax.block_until_ready(out)

    ref = reference_forward(x1, x2, params)
    assert out.shape == (N, 1, H - 2, W - 2), out.shape
    err = float(jnp.max(jnp.abs(out - ref)))
    assert err < 5e-3, f"mismatch vs reference: max abs err {err}"

    print("KERNEL_OK")
</pallas_src>

<mosaic_0001>
module attributes {stable_mosaic.version = 11 : i64} {
  func.func @_stage1_kernel(%arg0: i32, %arg1: memref<64x256xbf16, #tpu.memory_space<vmem>>, %arg2: memref<16x64xbf16, #tpu.memory_space<vmem>>, %arg3: memref<16x1xf32, #tpu.memory_space<vmem>>, %arg4: memref<8x16xf32, #tpu.memory_space<vmem>>, %arg5: memref<8x1xf32, #tpu.memory_space<vmem>>, %arg6: memref<8x256xf32, #tpu.memory_space<vmem>>) attributes {dimension_semantics = [#tpu.dimension_semantics<parallel>], iteration_bounds = array<i64: 2>, scalar_prefetch = 0 : i64, scratch_operands = 0 : i64, tpu.core_type = #tpu.core_type<tc>, window_params = [{transform_indices = @transform_0, window_bounds = array<i64: 64, 256>}, {pipeline_mode = #tpu.pipeline_mode<synchronous>, transform_indices = @transform_1, window_bounds = array<i64: 16, 64>}, {pipeline_mode = #tpu.pipeline_mode<synchronous>, transform_indices = @transform_2, window_bounds = array<i64: 16, 1>}, {pipeline_mode = #tpu.pipeline_mode<synchronous>, transform_indices = @transform_3, window_bounds = array<i64: 8, 16>}, {pipeline_mode = #tpu.pipeline_mode<synchronous>, transform_indices = @transform_4, window_bounds = array<i64: 8, 1>}, {transform_indices = @transform_5, window_bounds = array<i64: 8, 256>}]} {
    %c0 = arith.constant 0 : index
    %c0_0 = arith.constant 0 : index
    %0 = vector.load %arg2[%c0, %c0_0] : memref<16x64xbf16, #tpu.memory_space<vmem>>, vector<16x64xbf16>
    %c0_1 = arith.constant 0 : index
    %c0_2 = arith.constant 0 : index
    %1 = vector.load %arg1[%c0_1, %c0_2] : memref<64x256xbf16, #tpu.memory_space<vmem>>, vector<64x256xbf16>
    %cst = arith.constant dense<0.000000e+00> : vector<16x256xf32>
    %2 = tpu.matmul %0, %1, %cst {dimension_numbers = #tpu.dot_dimension_numbers<[1], [0], [0], [1], [0, 0, 1, 1], [], []>} : vector<16x64xbf16>, vector<64x256xbf16>, vector<16x256xf32> -> vector<16x256xf32>
    %c0_3 = arith.constant 0 : index
    %c0_4 = arith.constant 0 : index
    %3 = vector.load %arg3[%c0_3, %c0_4] : memref<16x1xf32, #tpu.memory_space<vmem>>, vector<16x1xf32>
    %4 = vector.broadcast %3 : vector<16x1xf32> to vector<16x256xf32>
    %5 = arith.addf %2, %4 : vector<16x256xf32>
    %cst_5 = arith.constant 2.000000e-01 : f32
    %6 = vector.broadcast %cst_5 : f32 to vector<16x256xf32>
    %7 = arith.mulf %6, %5 : vector<16x256xf32>
    %8 = arith.maximumf %5, %7 : vector<16x256xf32>
    %c0_6 = arith.constant 0 : index
    %c0_7 = arith.constant 0 : index
    %9 = vector.load %arg4[%c0_6, %c0_7] : memref<8x16xf32, #tpu.memory_space<vmem>>, vector<8x16xf32>
    %cst_8 = arith.constant dense<0.000000e+00> : vector<8x256xf32>
    %10 = tpu.matmul %9, %8, %cst_8 {dimension_numbers = #tpu.dot_dimension_numbers<[1], [0], [0], [1], [0, 0, 1, 1], [], []>} : vector<8x16xf32>, vector<16x256xf32>, vector<8x256xf32> -> vector<8x256xf32>
    %c0_9 = arith.constant 0 : index
    %c0_10 = arith.constant 0 : index
    %11 = vector.load %arg5[%c0_9, %c0_10] : memref<8x1xf32, #tpu.memory_space<vmem>>, vector<8x1xf32>
    %12 = vector.broadcast %11 : vector<8x1xf32> to vector<8x256xf32>
    %13 = arith.addf %10, %12 : vector<8x256xf32>
    %c0_11 = arith.constant 0 : index
    %c0_12 = arith.constant 0 : index
    %14 = vector.load %arg6[%c0_11, %c0_12] : memref<8x256xf32, #tpu.memory_space<vmem>>, vector<8x256xf32>
    tpu.vector_store %arg6[%c0_11, %c0_12], %13 {strides = array<i32>} : memref<8x256xf32, #tpu.memory_space<vmem>>, vector<8x256xf32>,
    return
  }
  func.func @transform_0(%arg0: i32) -> (i32, i32) {
    %c0_i32 = arith.constant 0 : i32
    %c0_i32_0 = arith.constant 0 : i32
    return %c0_i32, %arg0 : i32, i32
  }
  func.func @transform_1(%arg0: i32) -> (i32, i32) {
    %c0_i32 = arith.constant 0 : i32
    %c0_i32_0 = arith.constant 0 : i32
    %c0_i32_1 = arith.constant 0 : i32
    return %c0_i32, %c0_i32_0 : i32, i32
  }
  func.func @transform_2(%arg0: i32) -> (i32, i32) {
    %c0_i32 = arith.constant 0 : i32
    %c0_i32_0 = arith.constant 0 : i32
    %c0_i32_1 = arith.constant 0 : i32
    return %c0_i32, %c0_i32_0 : i32, i32
  }
  func.func @transform_3(%arg0: i32) -> (i32, i32) {
    %c0_i32 = arith.constant 0 : i32
    %c0_i32_0 = arith.constant 0 : i32
    %c0_i32_1 = arith.constant 0 : i32
    return %c0_i32, %c0_i32_0 : i32, i32
  }
  func.func @transform_4(%arg0: i32) -> (i32, i32) {
    %c0_i32 = arith.constant 0 : i32
    %c0_i32_0 = arith.constant 0 : i32
    %c0_i32_1 = arith.constant 0 : i32
    return %c0_i32, %c0_i32_0 : i32, i32
  }
  func.func @transform_5(%arg0: i32) -> (i32, i32) {
    %c0_i32 = arith.constant 0 : i32
    %c0_i32_0 = arith.constant 0 : i32
    return %c0_i32, %arg0 : i32, i32
  }
}

module attributes {stable_mosaic.version = 11 : i64} {
  func.func @_stage2_kernel(%arg0: i32, %arg1: memref<8x256xf32, #tpu.memory_space<vmem>>, %arg2: memref<8x1xf32, #tpu.memory_space<vmem>>, %arg3: memref<8x1xf32, #tpu.memory_space<vmem>>, %arg4: memref<8x1xf32, #tpu.memory_space<vmem>>, %arg5: memref<1x1xf32, #tpu.memory_space<vmem>>, %arg6: memref<1x256xf32, #tpu.memory_space<vmem>>) attributes {dimension_semantics = [#tpu.dimension_semantics<parallel>], iteration_bounds = array<i64: 2>, scalar_prefetch = 0 : i64, scratch_operands = 0 : i64, tpu.core_type = #tpu.core_type<tc>, window_params = [{transform_indices = @transform_0, window_bounds = array<i64: 8, 256>}, {pipeline_mode = #tpu.pipeline_mode<synchronous>, transform_indices = @transform_1, window_bounds = array<i64: 8, 1>}, {pipeline_mode = #tpu.pipeline_mode<synchronous>, transform_indices = @transform_2, window_bounds = array<i64: 8, 1>}, {pipeline_mode = #tpu.pipeline_mode<synchronous>, transform_indices = @transform_3, window_bounds = array<i64: 8, 1>}, {pipeline_mode = #tpu.pipeline_mode<synchronous>, transform_indices = @transform_4, window_bounds = array<i64: 1, 1>}, {transform_indices = @transform_5, window_bounds = array<i64: 1, 256>}]} {
    %c0 = arith.constant 0 : index
    %c0_0 = arith.constant 0 : index
    %0 = vector.load %arg1[%c0, %c0_0] : memref<8x256xf32, #tpu.memory_space<vmem>>, vector<8x256xf32>
    %c0_1 = arith.constant 0 : index
    %c0_2 = arith.constant 0 : index
    %1 = vector.load %arg2[%c0_1, %c0_2] : memref<8x1xf32, #tpu.memory_space<vmem>>, vector<8x1xf32>
    %2 = vector.broadcast %1 : vector<8x1xf32> to vector<8x256xf32>
    %3 = arith.mulf %0, %2 : vector<8x256xf32>
    %c0_3 = arith.constant 0 : index
    %c0_4 = arith.constant 0 : index
    %4 = vector.load %arg3[%c0_3, %c0_4] : memref<8x1xf32, #tpu.memory_space<vmem>>, vector<8x1xf32>
    %5 = vector.broadcast %4 : vector<8x1xf32> to vector<8x256xf32>
    %6 = arith.addf %3, %5 : vector<8x256xf32>
    %cst = arith.constant 2.000000e-01 : f32
    %7 = vector.broadcast %cst : f32 to vector<8x256xf32>
    %8 = arith.mulf %7, %6 : vector<8x256xf32>
    %9 = arith.maximumf %6, %8 : vector<8x256xf32>
    %c0_5 = arith.constant 0 : index
    %c0_6 = arith.constant 0 : index
    %10 = vector.load %arg4[%c0_5, %c0_6] : memref<8x1xf32, #tpu.memory_space<vmem>>, vector<8x1xf32>
    %11 = vector.broadcast %10 : vector<8x1xf32> to vector<8x256xf32>
    %12 = arith.mulf %9, %11 : vector<8x256xf32>
    %cst_7 = arith.constant dense<0.000000e+00> : vector<256xf32>
    %13 = vector.multi_reduction <add>, %12, %cst_7 [0] : vector<8x256xf32> to vector<256xf32>
    %14 = vector.shape_cast %13 : vector<256xf32> to vector<1x256xf32>
    %c0_8 = arith.constant 0 : index
    %c0_9 = arith.constant 0 : index
    %15 = vector.load %arg5[%c0_8, %c0_9] : memref<1x1xf32, #tpu.memory_space<vmem>>, vector<1x1xf32>
    %16 = vector.broadcast %15 : vector<1x1xf32> to vector<1x256xf32>
    %17 = arith.addf %14, %16 : vector<1x256xf32>
    %18 = arith.negf %17 : vector<1x256xf32>
    %19 = math.exp %18 : vector<1x256xf32>
    %cst_10 = arith.constant 1.000000e+00 : f32
    %20 = vector.broadcast %cst_10 : f32 to vector<1x256xf32>
    %21 = arith.addf %20, %19 : vector<1x256xf32>
    %22 = arith.divf %20, %21 : vector<1x256xf32>
    %c0_11 = arith.constant 0 : index
    %c0_12 = arith.constant 0 : index
    %23 = vector.load %arg6[%c0_11, %c0_12] : memref<1x256xf32, #tpu.memory_space<vmem>>, vector<1x256xf32>
    tpu.vector_store %arg6[%c0_11, %c0_12], %22 {strides = array<i32>} : memref<1x256xf32, #tpu.memory_space<vmem>>, vector<1x256xf32>,
    return
  }
  func.func @transform_0(%arg0: i32) -> (i32, i32) {
    %c0_i32 = arith.constant 0 : i32
    %c0_i32_0 = arith.constant 0 : i32
    return %c0_i32, %arg0 : i32, i32
  }
  func.func @transform_1(%arg0: i32) -> (i32, i32) {
    %c0_i32 = arith.constant 0 : i32
    %c0_i32_0 = arith.constant 0 : i32
    %c0_i32_1 = arith.constant 0 : i32
    return %c0_i32, %c0_i32_0 : i32, i32
  }
  func.func @transform_2(%arg0: i32) -> (i32, i32) {
    %c0_i32 = arith.constant 0 : i32
    %c0_i32_0 = arith.constant 0 : i32
    %c0_i32_1 = arith.constant 0 : i32
    return %c0_i32, %c0_i32_0 : i32, i32
  }
  func.func @transform_3(%arg0: i32) -> (i32, i32) {
    %c0_i32 = arith.constant 0 : i32
    %c0_i32_0 = arith.constant 0 : i32
    %c0_i32_1 = arith.constant 0 : i32
    return %c0_i32, %c0_i32_0 : i32, i32
  }
  func.func @transform_4(%arg0: i32) -> (i32, i32) {
    %c0_i32 = arith.constant 0 : i32
    %c0_i32_0 = arith.constant 0 : i32
    %c0_i32_1 = arith.constant 0 : i32
    return %c0_i32, %c0_i32_0 : i32, i32
  }
  func.func @transform_5(%arg0: i32) -> (i32, i32) {
    %c0_i32 = arith.constant 0 : i32
    %c0_i32_0 = arith.constant 0 : i32
    return %c0_i32, %arg0 : i32, i32
  }
}

</mosaic_0001>

<bundles_post_ra>
// kernel: squeeze.0
= control target key start
LH: loop header
LB: loop body
LE: loop exit
PB: predicated region body
PF: predicated region fallthrough
CT: control target
= control target key end

     0   :  { %s514_s0 = inlined_call_operand.vmem [shape: f32[392], index: 0, kind: input, shape index: {}]   ;;  %s515_s1 = inlined_call_operand.hbm [shape: f32[2,1,14,14], index: 1, kind: output, shape index: {}]  }
   0x1   :  { %v5_v0 = vld [vmem:[%s514_s0] sm:$0xf] }
   0x2   :  { %2 = vsyncpa [#allocation1], 0  ;;  %6 = vst [vmem:[#allocation3] sm:$0xf] %v5_v0  ;;  %s445_s0 = smov 114   ;;  %s446_s8 = smov 118  }
   0x3   :  { %s447_s9 = smov 102   ;;  %s448_s10 = smov 104   ;;  %vm174_vm0 = vcmask 998400   ;;  %vm201_vm1 = vcmask 1031168   ;;  %vm188_vm2 = vcmask 1014784   ;;  %vm8_vm3 = vcmask 113664  }
   0x4   :  { %s449_s11 = smov 116   ;;  %s450_s12 = smov 100   ;;  %vm178_vm4 = vcmask 48128   ;;  %vm181_vm5 = vcmask 113712   ;;  %vm205_vm6 = vcmask 15360   ;;  %vm208_vm7 = vcmask 113680  }
   0x5   :  { %s451_s13 = smov 88   ;;  %s452_s14 = smov 90   ;;  %vm192_vm8 = vcmask 31744   ;;  %vm195_vm9 = vcmask 113696  }
   0x6   :  { %s453_s15 = smov 86   ;;  %s454_s16 = smov 74  }
   0x7   :  { %s455_s17 = smov 76   ;;  %s456_s18 = smov 6  }
   0x8   :  { %s457_s19 = smov 2   ;;  %s458_s20 = smov 4  }
   0x9   :  { %v24_v1 = vld [vmem:[#allocation3] sm:$0x1]   ;;  %v11_v2 = vld [vmem:[#allocation3 + $0x2] sm:$0x1]   ;;  %v38_v3 = vld [vmem:[#allocation3 + $0x1] sm:$0x1]  }
   0xa   :  { %25 = vrot.lane.b32.xlu1 %v24_v1, %s445_s0  ;;  %12 = vrot.lane.b32.xlu0 %v11_v2, %s446_s8  ;;  %v31_v4 = vld [vmem:[#allocation3 + $0x2] sm:$0x1]   ;;  %v18_v5 = vld [vmem:[#allocation3 + $0x1] sm:$0x1]   ;;  %v44_v6 = vld [vmem:[#allocation3] sm:$0x1]  }
   0xb   :  { %39 = vrot.lane.b32.xlu2 %v38_v3, %s447_s9  ;;  %v58_v7 = vld [vmem:[#allocation3 + $0x1] sm:$0x1]   ;;  %v51_v8 = vld [vmem:[#allocation3 + $0x2] sm:$0x1]   ;;  %v64_v9 = vld [vmem:[#allocation3] sm:$0x1]  }
   0xc   :  { %v171_v10 = vld [vmem:[#allocation3 + $0x2] sm:$0x1]   ;;  %v173_v11 = vld [vmem:[#allocation3 + $0x3] sm:$0x1]   ;;  %v78_v12 = vld [vmem:[#allocation3 + $0x1] sm:$0x1]  }
   0xd   :  { %v71_v13 = vld [vmem:[#allocation3 + $0x2] sm:$0x1]   ;;  %v175_v14 = vsel %vm174_vm0, %v173_v11, %v171_v10  ;;  %v198_v15 = vld [vmem:[#allocation3] sm:$0x1]   ;;  %v200_v16 = vld [vmem:[#allocation3 + $0x1] sm:$0x1]  }
   0xe   :  { %v185_v17 = vld [vmem:[#allocation3 + $0x1] sm:$0x1]   ;;  %v187_v18 = vld [vmem:[#allocation3 + $0x2] sm:$0x1]   ;;  %v202_v19 = vsel %vm201_vm1, %v200_v16, %v198_v15  ;;  %v84_v21 = vld [vmem:[#allocation3] sm:$0x1]  }
   0xf   :  { %v189_v20 = vsel %vm188_vm2, %v187_v18, %v185_v17  ;;  %s459_s21 = smov 72   ;;  %v98_v22 = vld [vmem:[#allocation3 + $0x1] sm:$0x1]   ;;  %v91_v23 = vld [vmem:[#allocation3 + $0x2] sm:$0x1]   ;;  %s460_s22 = smov 60  }
  0x10   :  { %v104_v24 = vld [vmem:[#allocation3] sm:$0x1]   ;;  %s461_s23 = smov 62   ;;  %s462_s24 = smov 58   ;;  %v118_v25 = vld [vmem:[#allocation3 + $0x1] sm:$0x1]  }
  0x11   :  { %v111_v26 = vld [vmem:[#allocation3 + $0x2] sm:$0x1]   ;;  %v124_v27 = vld [vmem:[#allocation3] sm:$0x1]   ;;  %s463_s25 = smov 46   ;;  %s464_s26 = smov 48  }
  0x12   :  { %32 = vrot.lane.b32.xlu1 %v31_v4, %s448_s10  ;;  %19 = vrot.lane.b32.xlu0 %v18_v5, %s449_s11  ;;  %s465_s27 = smov 44   ;;  %v138_v28 = vld [vmem:[#allocation3 + $0x1] sm:$0x1]   ;;  %v131_v29 = vld [vmem:[#allocation3 + $0x2] sm:$0x1]   ;;  %s466_s28 = smov 32  }
  0x13   :  { %45 = vrot.lane.b32.xlu2 %v44_v6, %s450_s12  ;;  %v144_v30 = vld [vmem:[#allocation3] sm:$0x1]   ;;  %s467_s29 = smov 34   ;;  %s468_s30 = smov 30   ;;  %v158_v31 = vld [vmem:[#allocation3 + $0x1] sm:$0x1]  }
  0x14   :  { %v151_v32 = vld [vmem:[#allocation3 + $0x2] sm:$0x1]   ;;  %v164_v33 = vld [vmem:[#allocation3] sm:$0x1]   ;;  %s469_s2 = smov 18   ;;  %s470_s3 = smov 20  }
  0x15   :  { %s471_s4 = smov 16   ;;  %s472_s5 = smov [#allocation0]  }
  0x16   :  { %s382_s6 = sshll.u32 %s472_s5, 4  ;;  %s384_s1 = sshll.u32 %s515_s1, 4  ;;  %s383_s6 = int_to_ptr.vmem [resolvable:$true] %s382_s6  ;;  %s385_s1 = int_to_ptr.hbm [resolvable:$true] %s384_s1 }
  0x1a   :  { %59 = vrot.lane.b32.xlu1 %v58_v7, %s451_s13  ;;  %52 = vrot.lane.b32.xlu0 %v51_v8, %s452_s14  ;;  %v7_v7 = vld [vmem:[#allocation3] sm:$0x1]  }
  0x1b   :  { %65 = vrot.lane.b32.xlu2 %v64_v9, %s453_s15  ;;  %9 = vst.msk [vmem:[#allocation2] sm:$0x1] %vm8_vm3, %v7_v7  }
  0x22   :  { %79 = vrot.lane.b32.xlu1 %v78_v12, %s454_s16  ;;  %72 = vrot.lane.b32.xlu0 %v71_v13, %s455_s17  ;;  %v213_v15 = vld [vmem:[#allocation2] sm:$0x1] }
  0x23   :  { %176 = vrot.lane.b32.xlu2 %v175_v14, %s456_s18  ;;  %216 = vst [vmem:[#allocation0] sm:$0x1] %v213_v15 }
  0x2a   :  { %203 = vrot.lane.b32.xlu1 %v202_v19, %s457_s19  ;;  %190 = vrot.lane.b32.xlu0 %v189_v20, %s458_s20 }
  0x2b   :  { %85 = vrot.lane.b32.xlu2 %v84_v21, %s459_s21 }
  0x32   :  { %99 = vrot.lane.b32.xlu1 %v98_v22, %s460_s22  ;;  %92 = vrot.lane.b32.xlu0 %v91_v23, %s461_s23 }
  0x33   :  { %105 = vrot.lane.b32.xlu2 %v104_v24, %s462_s24 }
  0x3a   :  { %119 = vrot.lane.b32.xlu1 %v118_v25, %s463_s25  ;;  %112 = vrot.lane.b32.xlu0 %v111_v26, %s464_s26 }
  0x3b   :  { %125 = vrot.lane.b32.xlu2 %v124_v27, %s465_s27 }
  0x42   :  { %139 = vrot.lane.b32.xlu1 %v138_v28, %s466_s28  ;;  %132 = vrot.lane.b32.xlu0 %v131_v29, %s467_s29 }
  0x43   :  { %145 = vrot.lane.b32.xlu2 %v144_v30, %s468_s30 }
  0x4a   :  { %159 = vrot.lane.b32.xlu1 %v158_v31, %s469_s2  ;;  %152 = vrot.lane.b32.xlu0 %v151_v32, %s470_s3 }
  0x4b   :  { %165 = vrot.lane.b32.xlu2 %v164_v33, %s471_s4 }
  0x65   :  { %v40_v34 = vpop.permute.xlu2 %39  }
  0x66   :  { %43 = vst.msk [vmem:[#allocation2 + $0x58] sm:$0x1] %vm8_vm3, %v40_v34  }
  0x6d   :  { %v278_v35 = vld [vmem:[#allocation2 + $0x58] sm:$0x1]  ;;  %v46_v36 = vpop.permute.xlu2 %45  }
  0x6e   :  { %282 = vst [vmem:[#allocation0 + $0xb] sm:$0x1] %v278_v35 }
  0x6f   :  { %49 = vst.msk [vmem:[#allocation2 + $0x10] sm:$0x1] %vm8_vm3, %v46_v36  }
  0x75   :  { %v66_v37 = vpop.permute.xlu2 %65  }
  0x76   :  { %v224_v38 = vld [vmem:[#allocation2 + $0x10] sm:$0x1]  ;;  %69 = vst.msk [vmem:[#allocation2 + $0x18] sm:$0x1] %vm8_vm3, %v66_v37  }
  0x77   :  { %228 = vst [vmem:[#allocation0 + $0x2] sm:$0x1] %v224_v38 }
  0x7c   :  { %v26_v39 = vpop.permute.xlu1 %25   ;;  %v13_v40 = vpop.permute.xlu0 %12  }
  0x7d   :  { %29 = vst.msk [vmem:[#allocation2 + $0x8] sm:$0x1] %vm8_vm3, %v26_v39   ;;  %v230_v41 = vld [vmem:[#allocation2 + $0x18] sm:$0x1]  ;;  %v177_v42 = vpop.permute.xlu2 %176  }
  0x7e   :  { %16 = vst.msk [vmem:[#allocation2 + $0x98] sm:$0x1] %vm8_vm3, %v13_v40  }
  0x7f   :  { %234 = vst [vmem:[#allocation0 + $0x3] sm:$0x1] %v230_v41 }
  0x80   :  { %180 = vst.msk [vmem:[#allocation2 + $0xd8] sm:$0x1] %vm178_vm4, %v177_v42  }
  0x81   :  { %183 = vst.msk [vmem:[#allocation2 + $0xd8] sm:$0x1] %vm181_vm5, %v177_v42  }
  0x84   :  { %v218_v43 = vld [vmem:[#allocation2 + $0x8] sm:$0x1]  ;;  %v33_v44 = vpop.permute.xlu1 %32   ;;  %v20_v45 = vpop.permute.xlu0 %19  }
  0x85   :  { %222 = vst [vmem:[#allocation0 + $0x1] sm:$0x1] %v218_v43  ;;  %v326_v46 = vld [vmem:[#allocation2 + $0x98] sm:$0x1]  ;;  %v86_v47 = vpop.permute.xlu2 %85  }
  0x86   :  { %330 = vst [vmem:[#allocation0 + $0x13] sm:$0x1] %v326_v46 }
  0x87   :  { %36 = vst.msk [vmem:[#allocation2 + $0xa0] sm:$0x1] %vm8_vm3, %v33_v44  }
  0x88   :  { %23 = vst.msk [vmem:[#allocation2 + $0x50] sm:$0x1] %vm8_vm3, %v20_v45   ;;  %v374_v48 = vld [vmem:[#allocation2 + $0xd8] sm:$0x1] }
  0x89   :  { %378 = vst [vmem:[#allocation0 + $0x1b] sm:$0x1] %v374_v48 }
  0x8a   :  { %89 = vst.msk [vmem:[#allocation2 + $0x20] sm:$0x1] %vm8_vm3, %v86_v47  }
  0x8c   :  { %v60_v49 = vpop.permute.xlu1 %59   ;;  %v53_v50 = vpop.permute.xlu0 %52  }
  0x8d   :  { %63 = vst.msk [vmem:[#allocation2 + $0x60] sm:$0x1] %vm8_vm3, %v60_v49   ;;  %v106_v52 = vpop.permute.xlu2 %105  }
  0x8e   :  { %v332_v51 = vld [vmem:[#allocation2 + $0xa0] sm:$0x1]  ;;  %56 = vst.msk [vmem:[#allocation2 + $0xa8] sm:$0x1] %vm8_vm3, %v53_v50  }
  0x8f   :  { %336 = vst [vmem:[#allocation0 + $0x14] sm:$0x1] %v332_v51  ;;  %v272_v53 = vld [vmem:[#allocation2 + $0x50] sm:$0x1] }
  0x90   :  { %276 = vst [vmem:[#allocation0 + $0xa] sm:$0x1] %v272_v53 }
  0x91   :  { %v236_v54 = vld [vmem:[#allocation2 + $0x20] sm:$0x1]  ;;  %109 = vst.msk [vmem:[#allocation2 + $0x28] sm:$0x1] %vm8_vm3, %v106_v52  }
  0x92   :  { %240 = vst [vmem:[#allocation0 + $0x4] sm:$0x1] %v236_v54 }
  0x94   :  { %v284_v55 = vld [vmem:[#allocation2 + $0x60] sm:$0x1]  ;;  %v80_v56 = vpop.permute.xlu1 %79   ;;  %v73_v57 = vpop.permute.xlu0 %72  }
  0x95   :  { %288 = vst [vmem:[#allocation0 + $0xc] sm:$0x1] %v284_v55  ;;  %v338_v58 = vld [vmem:[#allocation2 + $0xa8] sm:$0x1]  ;;  %v126_v59 = vpop.permute.xlu2 %125  }
  0x96   :  { %342 = vst [vmem:[#allocation0 + $0x15] sm:$0x1] %v338_v58 }
  0x97   :  { %83 = vst.msk [vmem:[#allocation2 + $0x68] sm:$0x1] %vm8_vm3, %v80_v56  }
  0x98   :  { %76 = vst.msk [vmem:[#allocation2 + $0xb0] sm:$0x1] %vm8_vm3, %v73_v57   ;;  %v242_v60 = vld [vmem:[#allocation2 + $0x28] sm:$0x1] }
  0x99   :  { %246 = vst [vmem:[#allocation0 + $0x5] sm:$0x1] %v242_v60 }
  0x9a   :  { %129 = vst.msk [vmem:[#allocation2 + $0x30] sm:$0x1] %vm8_vm3, %v126_v59  }
  0x9c   :  { %v204_v61 = vpop.permute.xlu1 %203   ;;  %v191_v62 = vpop.permute.xlu0 %190  }
  0x9d   :  { %207 = vst.msk [vmem:[#allocation2 + $0x48] sm:$0x1] %vm205_vm6, %v204_v61   ;;  %v146_v0 = vpop.permute.xlu2 %145  }
  0x9e   :  { %v290_v63 = vld [vmem:[#allocation2 + $0x68] sm:$0x1]  ;;  %210 = vst.msk [vmem:[#allocation2 + $0x48] sm:$0x1] %vm208_vm7, %v204_v61  }
  0x9f   :  { %294 = vst [vmem:[#allocation0 + $0xd] sm:$0x1] %v290_v63  ;;  %v344_v1 = vld [vmem:[#allocation2 + $0xb0] sm:$0x1] }
  0xa0   :  { %348 = vst [vmem:[#allocation0 + $0x16] sm:$0x1] %v344_v1 }
  0xa1   :  { %194 = vst.msk [vmem:[#allocation2 + $0x90] sm:$0x1] %vm192_vm8, %v191_v62   ;;  %v248_v2 = vld [vmem:[#allocation2 + $0x30] sm:$0x1] }
  0xa2   :  { %197 = vst.msk [vmem:[#allocation2 + $0x90] sm:$0x1] %vm195_vm9, %v191_v62  }
  0xa3   :  { %252 = vst [vmem:[#allocation0 + $0x6] sm:$0x1] %v248_v2 }
  0xa4   :  { %v100_v3 = vpop.permute.xlu1 %99   ;;  %v93_v4 = vpop.permute.xlu0 %92   ;;  %149 = vst.msk [vmem:[#allocation2 + $0x38] sm:$0x1] %vm8_vm3, %v146_v0  }
  0xa5   :  { %v266_v5 = vld [vmem:[#allocation2 + $0x48] sm:$0x1]  ;;  %103 = vst.msk [vmem:[#allocation2 + $0x70] sm:$0x1] %vm8_vm3, %v100_v3   ;;  %v166_v6 = vpop.permute.xlu2 %165  }
  0xa6   :  { %270 = vst [vmem:[#allocation0 + $0x9] sm:$0x1] %v266_v5 }
  0xa7   :  { %96 = vst.msk [vmem:[#allocation2 + $0xb8] sm:$0x1] %vm8_vm3, %v93_v4  }
  0xa8   :  { %169 = vst.msk [vmem:[#allocation2 + $0x40] sm:$0x1] %vm8_vm3, %v166_v6  }
  0xa9   :  { %v320_v8 = vld [vmem:[#allocation2 + $0x90] sm:$0x1] }
  0xaa   :  { %324 = vst [vmem:[#allocation0 + $0x12] sm:$0x1] %v320_v8 }
  0xab   :  { %v254_v9 = vld [vmem:[#allocation2 + $0x38] sm:$0x1] }
  0xac   :  { %v296_v10 = vld [vmem:[#allocation2 + $0x70] sm:$0x1]  ;;  %v120_v11 = vpop.permute.xlu1 %119   ;;  %v113_v12 = vpop.permute.xlu0 %112   ;;  %258 = vst [vmem:[#allocation0 + $0x7] sm:$0x1] %v254_v9 }
  0xad   :  { %300 = vst [vmem:[#allocation0 + $0xe] sm:$0x1] %v296_v10 }
  0xae   :  { %v350_v13 = vld [vmem:[#allocation2 + $0xb8] sm:$0x1]  ;;  %123 = vst.msk [vmem:[#allocation2 + $0x78] sm:$0x1] %vm8_vm3, %v120_v11  }
  0xaf   :  { %354 = vst [vmem:[#allocation0 + $0x17] sm:$0x1] %v350_v13  ;;  %v260_v14 = vld [vmem:[#allocation2 + $0x40] sm:$0x1] }
  0xb0   :  { %116 = vst.msk [vmem:[#allocation2 + $0xc0] sm:$0x1] %vm8_vm3, %v113_v12  }
  0xb1   :  { %264 = vst [vmem:[#allocation0 + $0x8] sm:$0x1] %v260_v14 }
  0xb4   :  { %v140_v16 = vpop.permute.xlu1 %139   ;;  %v133_v17 = vpop.permute.xlu0 %132  }
  0xb5   :  { %v302_v18 = vld [vmem:[#allocation2 + $0x78] sm:$0x1]  ;;  %143 = vst.msk [vmem:[#allocation2 + $0x80] sm:$0x1] %vm8_vm3, %v140_v16  }
  0xb6   :  { %306 = vst [vmem:[#allocation0 + $0xf] sm:$0x1] %v302_v18 }
  0xb7   :  { %v356_v19 = vld [vmem:[#allocation2 + $0xc0] sm:$0x1]  ;;  %136 = vst.msk [vmem:[#allocation2 + $0xc8] sm:$0x1] %vm8_vm3, %v133_v17  }
  0xb8   :  { %360 = vst [vmem:[#allocation0 + $0x18] sm:$0x1] %v356_v19 }
  0xbc   :  { %v308_v20 = vld [vmem:[#allocation2 + $0x80] sm:$0x1]  ;;  %v160_v21 = vpop.permute.xlu1 %159   ;;  %v153_v22 = vpop.permute.xlu0 %152  }
  0xbd   :  { %312 = vst [vmem:[#allocation0 + $0x10] sm:$0x1] %v308_v20 }
  0xbe   :  { %v362_v23 = vld [vmem:[#allocation2 + $0xc8] sm:$0x1]  ;;  %163 = vst.msk [vmem:[#allocation2 + $0x88] sm:$0x1] %vm8_vm3, %v160_v21  }
  0xbf   :  { %366 = vst [vmem:[#allocation0 + $0x19] sm:$0x1] %v362_v23 }
  0xc0   :  { %156 = vst.msk [vmem:[#allocation2 + $0xd0] sm:$0x1] %vm8_vm3, %v153_v22  }
  0xc5   :  { %v314_v24 = vld [vmem:[#allocation2 + $0x88] sm:$0x1] }
  0xc6   :  { %318 = vst [vmem:[#allocation0 + $0x11] sm:$0x1] %v314_v24 }
  0xc7   :  { %v368_v25 = vld [vmem:[#allocation2 + $0xd0] sm:$0x1] }
  0xc8   :  { %372 = vst [vmem:[#allocation0 + $0x1a] sm:$0x1] %v368_v25 }
  0xc9   :  { %387 = dma.vmem_to_hbm [thread:$0]  %s383_s6, 448, %s385_s1, [#allocation1]  }
  0xca   :  { %443 = dma.done.wait [#allocation1], 448  }
  0xcb   :  { %444 = vsyncadd [#allocation1], 4294966848 }
  0xcc   :  { %390 = vsyncpa [#allocation1], 1 }

// kernel: discriminator_forward.3
= control target key start
LH: loop header
LB: loop body
LE: loop exit
PB: predicated region body
PF: predicated region fallthrough
CT: control target
= control target key end

     0   :  { %s451_s20 = smov 0   ;;  %s487_s0 = inlined_call_operand.vmem [shape: f32[8,512], index: 0, kind: input, shape index: {}]   ;;  %s488_s1 = inlined_call_operand.vmem [shape: f32[8,1], index: 1, kind: input, shape index: {}]   ;;  %s489_s2 = inlined_call_operand.vmem [shape: f32[8,1], index: 2, kind: input, shape index: {}]   ;;  %s490_s3 = inlined_call_operand.vmem [shape: f32[8,1], index: 3, kind: input, shape index: {}]   ;;  %s491_s4 = inlined_call_operand.<no memory space> [shape: f32[1,1], index: 4, kind: input, shape index: {}]   ;;  %s492_s5 = inlined_call_operand.vmem [shape: f32[1,512], index: 5, kind: output, shape index: {}]  }
   0x1   :  { %v10_v0 = vstv %s491_s4 }
   0x2   :  { %11 = vst [vmem:[#allocation2] sm:$0x1] %v10_v0 }
   0x3 LB: > { %s378_s21 = sadd.s32 4294967295, %s415_s20   ;;  %p382_p0 = scmp.ge.s32.totalorder %s415_s20, 1  ;;  %s415_s20 = sphi %s451_s20, %s17_s20  }
   0x4   : > { %p190_p1 = scmp.lt.s32.totalorder %s415_s20, 3 }
   0x6   : > { %p191_p2 = pnand %p382_p0, %p190_p1 }
   0x7   : > { %s383_s27 = sshll.u32 (!%p191_p2), %s378_s21, 1 }
   0x8   : > { %194 = sbr.rel (%p191_p2) target bundleno = 193 (0xc1), region = 40  ;;  %p218_p3 = scmp.lt.s32.totalorder (!%p191_p2), %s383_s27, 3 }
   0xd   : > { %v230_v1 = vld [vmem:[%s488_s1] sm:$0xff]  ;;  %v417_v3 = vmov 0   ;;  %s496_s27 = smov (!%p218_p3, %s383_s27), 3  ;;  %v323_v55 = vlaneseq  ;;  %vm320_vm7 = vcmask 1040384  }
   0xe   : > { %v250_v2 = vld [vmem:[%s490_s3] sm:$0xff]  ;;  %399 = vset.pattern.permute.xlu0 %v417_v3  ;;  %400 = vset.pattern.permute.xlu1 %v417_v3  ;;  %s384_s28 = sshll.u32 %s496_s27, 3  ;;  %s226_s9 = scalar_lea.vmem %s492_s5, %s496_s27 }
   0xf   : > { %233 = vperm.xlu0 %399, %v230_v1   ;;  %253 = vperm.xlu1 %400, %v250_v2   ;;  %v238_v4 = vld [vmem:[%s489_s2] sm:$0xff]  ;;  %s221_s6 = scalar_lea.vmem %s487_s0, %s384_s28  ;;  %vm325_vm8 = vcmp.lt.s32.totalorder %v323_v55, 256 }
  0x10   : > { %v270_v5 = vld [vmem:[#allocation2] sm:$0x1]  ;;  %v229_v8 = vld [vmem:[%s221_s6 + $0x8] sm:$0xff] }
  0x11   : > { %v228_v7 = vld [vmem:[%s221_s6] sm:$0xff] }
  0x17   : > { %241 = vperm.xlu0 %399, %v238_v4   ;;  %273 = vperm.xlu1 %400, %v270_v5  }
  0x81   : > { %v234_v6 = vpop.permute.xlu0 %233  ;;  %v254_v18 = vpop.permute.xlu1 %253 }
  0x82   : > { %v236_v9 = vmul.f32 %v234_v6, %v228_v7  ;;  %v237_v10 = vmul.f32 %v234_v6, %v229_v8 }
  0x89   : > { %v242_v11 = vpop.permute.xlu0 %241  ;;  %v274_v29 = vpop.permute.xlu1 %273 }
  0x8a   : > { %v244_v12 = vadd.f32 %v242_v11, %v236_v9  ;;  %v245_v13 = vadd.f32 %v242_v11, %v237_v10  ;;  %v276_v34 = vperm.slane %v274_v29, 0 }
  0x8c   : > { %v246_v14 = vmul.f32 0.2, %v244_v12  ;;  %v247_v15 = vmul.f32 0.2, %v245_v13 }
  0x8e   : > { %v248_v16 = vmax.f32 %v244_v12, %v246_v14  ;;  %v249_v17 = vmax.f32 %v245_v13, %v247_v15 }
  0x90   : > { %v256_v19 = vmul.f32 %v254_v18, %v248_v16  ;;  %v257_v20 = vmul.f32 %v254_v18, %v249_v17 }
  0x92   : > { %v258_v21 = vrot.slane %v256_v19, 4  ;;  %v264_v22 = vrot.slane %v257_v20, 4 }
  0x94   : > { %v259_v23 = vadd.f32 %v258_v21, %v256_v19  ;;  %v265_v24 = vadd.f32 %v264_v22, %v257_v20 }
  0x96   : > { %v260_v25 = vrot.slane %v259_v23, 2  ;;  %v266_v26 = vrot.slane %v265_v24, 2 }
  0x98   : > { %v261_v27 = vadd.f32 %v260_v25, %v259_v23  ;;  %v267_v28 = vadd.f32 %v266_v26, %v265_v24 }
  0x9a   : > { %v262_v30 = vrot.slane %v261_v27, 1  ;;  %v268_v31 = vrot.slane %v267_v28, 1 }
  0x9c   : > { %v263_v32 = vadd.f32 %v262_v30, %v261_v27  ;;  %v269_v33 = vadd.f32 %v268_v31, %v267_v28 }
  0x9e   : > { %v277_v35 = vadd.f32 %v276_v34, %v263_v32  ;;  %v278_v36 = vadd.f32 %v276_v34, %v269_v33 }
  0xa0   : > { %v386_v37 = vmul.f32 -1.442695, %v277_v35  ;;  %v387_v38 = vmul.f32 -1.442695, %v278_v36 }
  0xa2   : > { %401 = vpow2.f32 %v386_v37 }
  0xa3   : > { %403 = vpow2.f32 %v387_v38 }
  0xa8   : > { %v402_v39 = vpop.eup %401 }
  0xa9   : > { %v404_v40 = vpop.eup %403  ;;  %v285_v41 = vadd.f32 1.0, %v402_v39 }
  0xaa   : > { %v286_v42 = vadd.f32 1.0, %v404_v40 }
  0xab   : > { %405 = vrcp.f32 %v285_v41  ;;  %vm292_vm2 = vweird.f32 %v285_v41  ;;  %v298_v54 = vand.u32 2147483648, %v285_v41  ;;  %v296_v57 = vand.u32 2147483647, %v285_v41 }
  0xac   : > { %407 = vrcp.f32 %v286_v42  ;;  %v313_v50 = vand.u32 2147483648, %v286_v42  ;;  %v311_v52 = vand.u32 2147483647, %v286_v42  ;;  %vm307_vm4 = vweird.f32 %v286_v42 }
  0xad   : > { %v299_v62 = vor.u32 1.1754944e-38, %v298_v54  ;;  %vm297_vm9 = vcmp.eq.f32.partialorder %v296_v57, 8.507059e+37 }
  0xae   : > { %v314_v59 = vor.u32 1.1754944e-38, %v313_v50  ;;  %vm312_vm6 = vcmp.eq.f32.partialorder %v311_v52, 8.507059e+37 }
  0xb1   : > { %v406_v43 = vpop.eup %405 }
  0xb2   : > { %v408_v44 = vpop.eup %407  ;;  %v288_v45 = vmul.f32 %v406_v43, %v285_v41  ;;  %vm293_vm0 = vweird.f32 %v406_v43 }
  0xb3   : > { %v303_v46 = vmul.f32 %v408_v44, %v286_v42  ;;  %vm308_vm1 = vweird.f32 %v408_v44  ;;  %vm474_vm3 = vmor %vm292_vm2, %vm293_vm0 }
  0xb4   : > { %v289_v47 = vsub.f32 1.0, %v288_v45  ;;  %vm309_vm5 = vmor %vm307_vm4, %vm308_vm1 }
  0xb5   : > { %v304_v48 = vsub.f32 1.0, %v303_v46 }
  0xb6   : > { %v290_v49 = vmul.f32 %v406_v43, %v289_v47 }
  0xb7   : > { %v305_v51 = vmul.f32 %v408_v44, %v304_v48 }
  0xb8   : > { %v291_v53 = vadd.f32 %v406_v43, %v290_v49 }
  0xb9   : > { %v306_v58 = vadd.f32 %v408_v44, %v305_v51 }
  0xba   : > { %v295_v60 = vsel %vm474_vm3, %v406_v43, %v291_v53 }
  0xbb   : > { %v310_v61 = vsel %vm309_vm5, %v408_v44, %v306_v58  ;;  %v300_v1 = vsel %vm297_vm9, %v299_v62, %v295_v60 }
  0xbc   : > { %v315_v63 = vsel %vm312_vm6, %v314_v59, %v310_v61 }
  0xbd   : > { %v319_v0 = vrot.slane %v315_v63, 7 }
  0xbf   : > { %v321_v2 = vsel %vm320_vm7, %v300_v1, %v319_v0 }
  0xc0   : > { %327 = vst.msk [vmem:[%s226_s9] sm:$0x3] %vm325_vm8, %v321_v2 }
  0xc1 PF: > { %s17_s20 = sadd.s32 1, %s415_s20  }
  0xc2   : > { %p14_p4 = scmp.ge.s32.totalorder %s17_s20, 4  }
  0xc4   :  { %16 = sbr.rel (!%p14_p4) target bundleno = 3 (0x3), region = 70 }

// kernel: discriminator_forward.2
= control target key start
LH: loop header
LB: loop body
LE: loop exit
PB: predicated region body
PF: predicated region fallthrough
CT: control target
= control target key end

     0   :  { %s659_s18 = smov 0   ;;  %s661_s19 = smov 0   ;;  %s726_s0 = inlined_call_operand.vmem [shape: bf16[64,512], index: 0, kind: input, shape index: {}]   ;;  %s727_s1 = inlined_call_operand.vmem [shape: bf16[16,64], index: 1, kind: input, shape index: {}]   ;;  %s728_s2 = inlined_call_operand.vmem [shape: f32[16,1], index: 2, kind: input, shape index: {}]   ;;  %s729_s3 = inlined_call_operand.vmem [shape: f32[8,16], index: 3, kind: input, shape index: {}]   ;;  %s730_s4 = inlined_call_operand.vmem [shape: f32[8,1], index: 4, kind: input, shape index: {}]   ;;  %s731_s5 = inlined_call_operand.vmem [shape: f32[8,512], index: 5, kind: output, shape index: {}]  }
   0x1   :  { %s663_s20 = smov 0  }
   0x2 LB: > { %s514_s21 = sadd.s32 4294967295, %s626_s20   ;;  %s676_s22 = sadd.s32 1, %s626_s20   ;;  %s626_s20 = sphi %s663_s20, %s734_s20   ;;  %s622_s19 = sphi %s661_s19, %s733_s19   ;;  %s618_s18 = sphi %s659_s18, %s732_s18  }
   0x3   : > { %s19_s23 = ssub.s32 %s626_s20, %s676_s22  ;;  %s22_s24 = sadd.s32 1, %s622_s19 }
   0x4   : > { %p20_p0 = scmp.eq.s32.totalorder %s19_s23, 0  ;;  %p29_p1 = scmp.ne.s32.totalorder %s622_s19, %s618_s18 }
   0x5   : > { %p30_p2 = scmp.eq.s32.totalorder %s626_s20, 0  ;;  %p517_p4 = scmp.ge.s32.totalorder %s626_s20, 2 }
   0x6   : > { %s685_s25 = scalar_select %p20_p0, %s622_s19, %s22_s24  }
   0x7   : > { %p31_p3 = por %p30_p2, %p29_p1  ;;  %177 = sbr.rel (%p517_p4) target bundleno = 24 (0x18), region = 32 }
   0xc   : > { %180 = sbr.rel (!%p31_p3) target bundleno = 24 (0x18), region = 36  ;;  %s182_s26 = sand.u32 (%p31_p3), 1, %s622_s19  }
   0xd   : > { %s567_s27 = sshll.u32 (%p31_p3), %s626_s20, 3  ;;  %s518_s28 = sshll.u32 (%p31_p3), %s182_s26, 6 }
   0xe   : > { %s187_s6 = scalar_lea.vmem (%p31_p3), %s726_s0, %s567_s27  ;;  %s184_s7 = scalar_lea.vmem (%p31_p3), [#allocation2], %s518_s28 }
   0xf   : > { %v230_v0 = vld [vmem:[%s187_s6] sm:$0xff] (%p31_p3)  ;;  %v232_v1 = vld [vmem:[%s187_s6 + $0x10] sm:$0xff] (%p31_p3) }
  0x10   : > { %v234_v2 = vld [vmem:[%s187_s6 + $0x20] sm:$0xff] (%p31_p3)  ;;  %231 = vst [vmem:[%s184_s7] sm:$0xff] (%p31_p3), %v230_v0  ;;  %v236_v3 = vld [vmem:[%s187_s6 + $0x30] sm:$0xff] (%p31_p3) }
  0x11   : > { %233 = vst [vmem:[%s184_s7 + $0x8] sm:$0xff] %v232_v1  ;;  %v238_v4 = vld [vmem:[%s187_s6 + $0x40] sm:$0xff]  ;;  %v240_v5 = vld [vmem:[%s187_s6 + $0x50] sm:$0xff] }
  0x12   : > { %235 = vst [vmem:[%s184_s7 + $0x10] sm:$0xff] %v234_v2  ;;  %v242_v6 = vld [vmem:[%s187_s6 + $0x60] sm:$0xff]  ;;  %v244_v7 = vld [vmem:[%s187_s6 + $0x70] sm:$0xff] }
  0x13   : > { %237 = vst [vmem:[%s184_s7 + $0x18] sm:$0xff] %v236_v3 }
  0x14   : > { %239 = vst [vmem:[%s184_s7 + $0x20] sm:$0xff] %v238_v4 }
  0x15   : > { %241 = vst [vmem:[%s184_s7 + $0x28] sm:$0xff] %v240_v5 }
  0x16   : > { %243 = vst [vmem:[%s184_s7 + $0x30] sm:$0xff] %v242_v6 }
  0x17   : > { %245 = vst [vmem:[%s184_s7 + $0x38] sm:$0xff] %v244_v7 }
  0x18 PF: > { %p521_p5 = scmp.ge.s32.totalorder %s626_s20, 1  ;;  %p250_p6 = scmp.lt.s32.totalorder %s626_s20, 3 }
  0x1a   : > { %p251_p7 = pnand %p521_p5, %p250_p6 }
  0x1b   : > { %s257_s8 = sand.u32 (!%p251_p7), 1, %s618_s18   ;;  %s523_s26 = sshll.u32 (!%p251_p7), %s514_s21, 1 }
  0x1c   : > { %254 = sbr.rel (%p251_p7) target bundleno = 330 (0x14a), region = 74  ;;  %s522_s11 = sshll.u32 (!%p251_p7), %s257_s8, 6 }
  0x1d   : > { %s259_s12 = scalar_lea.vmem (!%p251_p7), [#allocation2], %s522_s11  ;;  %p286_p8 = scmp.lt.s32.totalorder (!%p251_p7), %s523_s26, 3 }
  0x21   : > { %v303_v8 = vld [vmem:[%s728_s2 + $0x8] sm:$0xff]  ;;  %v628_v9 = vmov 0   ;;  %v555_v10 = vld [vmem:[%s259_s12 + $0x30] sm:$0xf]  ;;  %v576_v11 = vld [vmem:[%s259_s12 + $0x34] sm:$0xf0] }
  0x22   : > { %602 = vset.pattern.permute.xlu0 %v628_v9  ;;  %603 = vset.pattern.permute.xlu1 %v628_v9  ;;  %v575_v12 = vld [vmem:[%s259_s12 + $0x34] sm:$0xf]  ;;  %v556_v13 = vor.u32 %v576_v11, %v555_v10  ;;  %v557_v14 = vld [vmem:[%s259_s12 + $0x38] sm:$0xf0]  ;;  %v547_v15 = vld [vmem:[%s259_s12 + $0x20] sm:$0xf] }
  0x23   : > { %311 = vperm.xlu0 %602, %v303_v8   ;;  %v574_v16 = vld [vmem:[%s259_s12 + $0x24] sm:$0xf0]  ;;  %v560_v17 = vor.u32 %v575_v12, %v557_v14  ;;  %v573_v18 = vld [vmem:[%s259_s12 + $0x24] sm:$0xf]  ;;  %v549_v19 = vld [vmem:[%s259_s12 + $0x28] sm:$0xf0] }
  0x24   : > { %367 = vmatpush.bf16.msra.mxu0 %v556_v13  ;;  %v548_v20 = vor.u32 %v574_v16, %v547_v15  ;;  %v552_v21 = vor.u32 %v573_v18, %v549_v19  ;;  %v539_v22 = vld [vmem:[%s259_s12 + $0x10] sm:$0xf]  ;;  %v572_v23 = vld [vmem:[%s259_s12 + $0x14] sm:$0xf0]  ;;  %v302_v24 = vld [vmem:[%s728_s2] sm:$0xff]  ;;  %vm359_vm0 = vcmask 523264  }
  0x25   : > { %381 = vmatpush.bf16.msra.mxu1 %v560_v17  ;;  %v571_v25 = vld [vmem:[%s259_s12 + $0x14] sm:$0xf]  ;;  %v541_v26 = vld [vmem:[%s259_s12 + $0x18] sm:$0xf0]  ;;  %v540_v27 = vor.u32 %v572_v23, %v539_v22  ;;  %v531_v29 = vld [vmem:[%s259_s12] sm:$0xf] }
  0x26   : > { %v544_v28 = vor.u32 %v571_v25, %v541_v26  ;;  %v570_v30 = vld [vmem:[%s259_s12 + $0x4] sm:$0xf0]  ;;  %v569_v31 = vld [vmem:[%s259_s12 + $0x4] sm:$0xf]  ;;  %v533_v32 = vld [vmem:[%s259_s12 + $0x8] sm:$0xf0] }
  0x27   : > { %v532_v33 = vor.u32 %v570_v30, %v531_v29  ;;  %v536_v34 = vor.u32 %v569_v31, %v533_v32  ;;  %v568_v35 = vld [vmem:[%s727_s1] sm:$0xff]  ;;  %vm406_vm1 = vcmask 130048   ;;  %s736_s26 = smov (!%p286_p8, %s523_s26), 3 }
  0x28   : > { %368 = vmatpush.bf16.msra.mxu0 %v548_v20  ;;  %v400_v36 = vld [vmem:[%s730_s4] sm:$0xff]  ;;  %s524_s27 = sshll.u32 %s736_s26, 3 }
  0x29   : > { %382 = vmatpush.bf16.msra.mxu1 %v552_v21  ;;  %403 = vperm.xlu1 %603, %v400_v36   ;;  %v399_v54 = vld [vmem:[%s729_s3] sm:$0xff]  ;;  %s289_s30 = scalar_lea.vmem %s731_s5, %s524_s27 }
  0x2b   : > { %306 = vperm.xlu0 %602, %v302_v24  }
  0x2c   : > { %369 = vmatpush.bf16.msra.mxu0 %v540_v27 }
  0x2d   : > { %383 = vmatpush.bf16.msra.mxu1 %v544_v28 }
  0x30   : > { %370 = vmatpush.bf16.msra.mxu0 %v532_v33 }
  0x31   : > { %384 = vmatpush.bf16.msra.mxu1 %v536_v34 }
  0x33   : > { %561 = vmatmul.msk.bf16.vlgmr.msra.gmra.mxu0 %vm359_vm0, %v568_v35 }
  0x34   : > { %562 = vmatmul.msk.bf16.vlgmr.msra.gmra.mxu1 %vm359_vm0, %v568_v35 }
  0x95   : > { %v312_v37 = vpop.permute.xlu0 %311 }
  0x9b   : > { %v404_v56 = vpop.permute.xlu1 %403 }
  0x9d   : > { %v307_v40 = vpop.permute.xlu0 %306 }
  0xb0   : > { %v372_v38 = vpop.f32.mrf.mxu0 }
  0xb1   : > { %v386_v39 = vpop.f32.mrf.mxu1  ;;  %v373_v41 = vadd.f32 %v372_v38, %v307_v40 }
  0xb2   : > { %v387_v42 = vadd.f32 %v386_v39, %v307_v40 }
  0xb3   : > { %v391_v47 = vmul.f32 0.2, %v373_v41 }
  0xb4   : > { %v392_v49 = vmul.f32 0.2, %v387_v42 }
  0xb5   : > { %v395_v53 = vmax.f32 %v373_v41, %v391_v47 }
  0xb6   : > { %v396_v55 = vmax.f32 %v387_v42, %v392_v49 }
  0xb8   : > { %v374_v43 = vpop.f32.mrf.mxu0 }
  0xb9   : > { %v375_v44 = vadd.f32 %v374_v43, %v312_v37  ;;  %v388_v45 = vpop.f32.mrf.mxu1 }
  0xba   : > { %v389_v46 = vadd.f32 %v388_v45, %v312_v37 }
  0xbb   : > { %v393_v48 = vmul.f32 0.2, %v375_v44 }
  0xbc   : > { %v394_v50 = vmul.f32 0.2, %v389_v46 }
  0xbd   : > { %v397_v51 = vmax.f32 %v375_v44, %v393_v48 }
  0xbe   : > { %v398_v52 = vmax.f32 %v389_v46, %v394_v50 }
  0xbf   : > { %424 = vmatpush.msra.mxu2 %v397_v51 }
  0xc0   : > { %444 = vmatpush.msra.mxu3 %v398_v52 }
  0xc1   : > { %425 = vmatpush.msra.mxu2 %v395_v53 }
  0xc2   : > { %445 = vmatpush.msra.mxu3 %v396_v55  ;;  %563 = vmatmul.msk.f32.vlgmr.msra.gmra.mxu2 %vm406_vm1, %v399_v54 }
  0xc3   : > { %564 = vmatmul.msk.f32.vlgmr.msra.gmra.mxu3 %vm406_vm1, %v399_v54 }
 0x145   : > { %v427_v57 = vpop.f32.mrf.mxu2 }
 0x146   : > { %v428_v58 = vadd.f32 %v427_v57, %v404_v56  ;;  %v447_v59 = vpop.f32.mrf.mxu3 }
 0x147   : > { %v448_v60 = vadd.f32 %v447_v59, %v404_v56 }
 0x148   : > { %450 = vst [vmem:[%s289_s30] sm:$0xff] %v428_v58 }
 0x149   : > { %451 = vst [vmem:[%s289_s30 + $0x8] sm:$0xff] %v448_v60 }
 0x14a PF: > { %p12_p9 = scmp.ge.s32.totalorder %s676_s22, 4   ;;  %s732_s18 = smov %s622_s19 }
 0x14b   : > { %s733_s19 = smov %s685_s25  ;;  %s734_s20 = smov %s676_s22 }
 0x14c   :  { %14 = sbr.rel (!%p12_p9) target bundleno = 2 (0x2), region = 113 }

</bundles_post_ra>
